<compile_context>
chip_gen: v6e
topology: v6e:2x2x1
jax: 0.10.0
libtpu: 0.0.40
codegen_flags: <defaults>
</compile_context>

<pallas_src>
import jax
import jax.numpy as jnp
from jax.experimental import pallas as pl
from jax.experimental.pallas import tpu as pltpu


def mlp_kernel(p_ref, x_ref, o_ref):
    """p_ref: (32,) f32 in SMEM -- pre-folded params:
                 [0:8]   a[f,i] = 0.5  * w1[f,i]   (row-major over f, i)
                 [8:12]  c[f]   = 0.5  * b1[f]
                 [12:16] d[f]   = 0.25 * w2[f]
                 [16]    e      = 0.25 * sum(w2) + 0.5 * b2
       x_ref: (2, tr, 128) f32 in VMEM -- feature on the leading axis,
              batch packed dense over (sublanes, lanes)
       o_ref: (tr, 128) f32 in VMEM -- sublane+lane dense output tile
    """
    x0 = x_ref[0]                                   # (tr, 128)
    x1 = x_ref[1]                                   # (tr, 128)

    # Layer 1 (Linear(2,4)+sigmoid) fused with the layer-2 contraction.
    acc = None
    for f in range(4):                              # unrolled at trace time
        t = jnp.tanh(p_ref[2 * f] * x0 + p_ref[2 * f + 1] * x1 + p_ref[8 + f])
        term = p_ref[12 + f] * t
        acc = term if acc is None else acc + term

    # Layer-2 sigmoid (its 0.5 pre-scale is already folded into d and e).
    y = 0.5 * jnp.tanh(acc + p_ref[16]) + 0.5
    o_ref[...] = y.astype(o_ref.dtype)


def _pack_params(w1, b1, w2, b2):
    """Fold both sigmoid(z)=0.5*tanh(0.5*z)+0.5 rewrites into the params."""
    w1 = jnp.asarray(w1, jnp.float32).reshape(4, 2)
    b1 = jnp.asarray(b1, jnp.float32).reshape(4)
    w2 = jnp.asarray(w2, jnp.float32).reshape(4)
    b2 = jnp.asarray(b2, jnp.float32).reshape(1)
    a = (0.5 * w1).reshape(-1)                              # 8 values
    c = 0.5 * b1                                            # 4 values
    d = 0.25 * w2                                           # 4 values
    e = 0.25 * jnp.sum(w2, keepdims=True) + 0.5 * b2        # 1 value
    params = jnp.concatenate([a, c, d, e])                  # 17 values
    return jnp.pad(params, (0, 32 - params.shape[0]))


def mlp_forward_feature_major(x_fm, w1, b1, w2, b2, *, tr=2048):
    """Fast path: x_fm is feature-major (2, B) float32. Returns (B, 1) f32."""
    f_in, batch = x_fm.shape
    assert f_in == 2
    params = _pack_params(w1, b1, w2, b2)

    # Pack the batch densely over (rows -> sublanes, 128 lanes).
    rows = -(-batch // 128)
    rows = -(-rows // 8) * 8                        # sublane multiple of 8
    # Tile rows: cap at `tr` (default 2048 rows ~ 3 MiB moved/step), but prefer
    # ~8 grid steps (megacore + double-buffering) with >=256-row steps.
    tr = min(tr, rows)
    tr = min(tr, max(256, -(-rows // 8)))
    tr = max(8, (tr // 8) * 8)
    rows_pad = ((rows + tr - 1) // tr) * tr
    b_pad = rows_pad * 128
    if b_pad != batch:
        x_fm = jnp.pad(x_fm, ((0, 0), (0, b_pad - batch)))
    x3 = x_fm.reshape(2, rows_pad, 128)             # free row-major view

    out = pl.pallas_call(
        mlp_kernel,
        out_shape=jax.ShapeDtypeStruct((rows_pad, 128), jnp.float32),
        grid=(rows_pad // tr,),
        in_specs=[
            # Packed parameter slab: whole array, resident in SMEM.
            pl.BlockSpec(memory_space=pltpu.MemorySpace.SMEM),
            # Input tile: (2, tr, 128), batch dense over sublanes+lanes.
            pl.BlockSpec((2, tr, 128), lambda i: (0, i, 0)),
        ],
        out_specs=pl.BlockSpec((tr, 128), lambda i: (i, 0)),
        compiler_params=pltpu.CompilerParams(
            dimension_semantics=("parallel",),      # megacore split on v7x
        ),
    )(params, x3)

    return out.reshape(-1)[:batch].reshape(batch, 1)


def mlp_forward(x, w1, b1, w2, b2, *, tr=2048):
    """PyTorch-layout entry point: x is (B, 2), returns (B, 1).

    The transpose below is one extra HBM pass over x; producers that can emit
    the feature-major (2, B) layout should call mlp_forward_feature_major.
    """
    # TODO(synk): fuse this (B,2)->(2,B) relayout into the upstream producer.
    x_fm = jnp.asarray(x, jnp.float32).T
    return mlp_forward_feature_major(x_fm, w1, b1, w2, b2, tr=tr)


def init_params(key):
    # PyTorch nn.Linear default init: U(-1/sqrt(fan_in), 1/sqrt(fan_in)),
    # weights stored in torch layout (F_out, F_in).
    k1, k2, k3, k4 = jax.random.split(key, 4)
    bound1 = 1.0 / jnp.sqrt(2.0)
    bound2 = 1.0 / jnp.sqrt(4.0)
    w1 = jax.random.uniform(k1, (4, 2), jnp.float32, -bound1, bound1)
    b1 = jax.random.uniform(k2, (4,), jnp.float32, -bound1, bound1)
    w2 = jax.random.uniform(k3, (1, 4), jnp.float32, -bound2, bound2)
    b2 = jax.random.uniform(k4, (1,), jnp.float32, -bound2, bound2)
    return w1, b1, w2, b2


def mlp_reference(x, w1, b1, w2, b2):
    h = jax.nn.sigmoid(x @ w1.T + b1)
    return jax.nn.sigmoid(h @ w2.T + b2)


if __name__ == "__main__":
    key = jax.random.PRNGKey(0)
    kx1, kx2, kp = jax.random.split(key, 3)
    w1, b1, w2, b2 = init_params(kp)

    # Case 1: ragged batch (exercises lane padding + output slice), 1 grid step.
    B1 = 1000
    x_a = jax.random.normal(kx1, (B1, 2), jnp.float32)
    out_a = jax.block_until_ready(mlp_forward(x_a, w1, b1, w2, b2))
    ref_a = mlp_reference(x_a, w1, b1, w2, b2)
    assert out_a.shape == (B1, 1)
    assert jnp.allclose(out_a, ref_a, atol=1e-5, rtol=1e-5)

    # Case 2: multi-step grid (tr forced small so the pipeline runs 4 steps).
    B2 = 4096
    x_b = jax.random.normal(kx2, (B2, 2), jnp.float32)
    out_b = jax.block_until_ready(mlp_forward(x_b, w1, b1, w2, b2, tr=8))
    ref_b = mlp_reference(x_b, w1, b1, w2, b2)
    assert out_b.shape == (B2, 1)
    assert jnp.allclose(out_b, ref_b, atol=1e-5, rtol=1e-5)

    print("KERNEL_OK")
</pallas_src>

<mosaic_0001>
module attributes {stable_mosaic.version = 11 : i64} {
  func.func @mlp_kernel(%arg0: i32, %arg1: memref<32xf32, #tpu.memory_space<smem>>, %arg2: memref<2x8x128xf32, #tpu.memory_space<vmem>>, %arg3: memref<8x128xf32, #tpu.memory_space<vmem>>) attributes {dimension_semantics = [#tpu.dimension_semantics<parallel>], iteration_bounds = array<i64: 1>, scalar_prefetch = 0 : i64, scratch_operands = 0 : i64, tpu.core_type = #tpu.core_type<tc>, window_params = [{transform_indices = @transform_0, window_bounds = array<i64: 32>}, {transform_indices = @transform_1, window_bounds = array<i64: 2, 8, 128>}, {transform_indices = @transform_2, window_bounds = array<i64: 8, 128>}]} {
    %c0 = arith.constant 0 : index
    %c0_0 = arith.constant 0 : index
    %c0_1 = arith.constant 0 : index
    %0 = vector.load %arg2[%c0, %c0_0, %c0_1] : memref<2x8x128xf32, #tpu.memory_space<vmem>>, vector<1x8x128xf32>
    %1 = vector.shape_cast %0 : vector<1x8x128xf32> to vector<8x128xf32>
    %c1 = arith.constant 1 : index
    %c0_2 = arith.constant 0 : index
    %c0_3 = arith.constant 0 : index
    %2 = vector.load %arg2[%c1, %c0_2, %c0_3] : memref<2x8x128xf32, #tpu.memory_space<vmem>>, vector<1x8x128xf32>
    %3 = vector.shape_cast %2 : vector<1x8x128xf32> to vector<8x128xf32>
    %c0_4 = arith.constant 0 : index
    %4 = memref.load %arg1[%c0_4] : memref<32xf32, #tpu.memory_space<smem>>
    %5 = vector.broadcast %4 : f32 to vector<8x128xf32>
    %6 = arith.mulf %5, %1 : vector<8x128xf32>
    %c1_5 = arith.constant 1 : index
    %7 = memref.load %arg1[%c1_5] : memref<32xf32, #tpu.memory_space<smem>>
    %8 = vector.broadcast %7 : f32 to vector<8x128xf32>
    %9 = arith.mulf %8, %3 : vector<8x128xf32>
    %10 = arith.addf %6, %9 : vector<8x128xf32>
    %c8 = arith.constant 8 : index
    %11 = memref.load %arg1[%c8] : memref<32xf32, #tpu.memory_space<smem>>
    %12 = vector.broadcast %11 : f32 to vector<8x128xf32>
    %13 = arith.addf %10, %12 : vector<8x128xf32>
    %14 = math.tanh %13 : vector<8x128xf32>
    %c12 = arith.constant 12 : index
    %15 = memref.load %arg1[%c12] : memref<32xf32, #tpu.memory_space<smem>>
    %16 = vector.broadcast %15 : f32 to vector<8x128xf32>
    %17 = arith.mulf %16, %14 : vector<8x128xf32>
    %c2 = arith.constant 2 : index
    %18 = memref.load %arg1[%c2] : memref<32xf32, #tpu.memory_space<smem>>
    %19 = vector.broadcast %18 : f32 to vector<8x128xf32>
    %20 = arith.mulf %19, %1 : vector<8x128xf32>
    %c3 = arith.constant 3 : index
    %21 = memref.load %arg1[%c3] : memref<32xf32, #tpu.memory_space<smem>>
    %22 = vector.broadcast %21 : f32 to vector<8x128xf32>
    %23 = arith.mulf %22, %3 : vector<8x128xf32>
    %24 = arith.addf %20, %23 : vector<8x128xf32>
    %c9 = arith.constant 9 : index
    %25 = memref.load %arg1[%c9] : memref<32xf32, #tpu.memory_space<smem>>
    %26 = vector.broadcast %25 : f32 to vector<8x128xf32>
    %27 = arith.addf %24, %26 : vector<8x128xf32>
    %28 = math.tanh %27 : vector<8x128xf32>
    %c13 = arith.constant 13 : index
    %29 = memref.load %arg1[%c13] : memref<32xf32, #tpu.memory_space<smem>>
    %30 = vector.broadcast %29 : f32 to vector<8x128xf32>
    %31 = arith.mulf %30, %28 : vector<8x128xf32>
    %32 = arith.addf %17, %31 : vector<8x128xf32>
    %c4 = arith.constant 4 : index
    %33 = memref.load %arg1[%c4] : memref<32xf32, #tpu.memory_space<smem>>
    %34 = vector.broadcast %33 : f32 to vector<8x128xf32>
    %35 = arith.mulf %34, %1 : vector<8x128xf32>
    %c5 = arith.constant 5 : index
    %36 = memref.load %arg1[%c5] : memref<32xf32, #tpu.memory_space<smem>>
    %37 = vector.broadcast %36 : f32 to vector<8x128xf32>
    %38 = arith.mulf %37, %3 : vector<8x128xf32>
    %39 = arith.addf %35, %38 : vector<8x128xf32>
    %c10 = arith.constant 10 : index
    %40 = memref.load %arg1[%c10] : memref<32xf32, #tpu.memory_space<smem>>
    %41 = vector.broadcast %40 : f32 to vector<8x128xf32>
    %42 = arith.addf %39, %41 : vector<8x128xf32>
    %43 = math.tanh %42 : vector<8x128xf32>
    %c14 = arith.constant 14 : index
    %44 = memref.load %arg1[%c14] : memref<32xf32, #tpu.memory_space<smem>>
    %45 = vector.broadcast %44 : f32 to vector<8x128xf32>
    %46 = arith.mulf %45, %43 : vector<8x128xf32>
    %47 = arith.addf %32, %46 : vector<8x128xf32>
    %c6 = arith.constant 6 : index
    %48 = memref.load %arg1[%c6] : memref<32xf32, #tpu.memory_space<smem>>
    %49 = vector.broadcast %48 : f32 to vector<8x128xf32>
    %50 = arith.mulf %49, %1 : vector<8x128xf32>
    %c7 = arith.constant 7 : index
    %51 = memref.load %arg1[%c7] : memref<32xf32, #tpu.memory_space<smem>>
    %52 = vector.broadcast %51 : f32 to vector<8x128xf32>
    %53 = arith.mulf %52, %3 : vector<8x128xf32>
    %54 = arith.addf %50, %53 : vector<8x128xf32>
    %c11 = arith.constant 11 : index
    %55 = memref.load %arg1[%c11] : memref<32xf32, #tpu.memory_space<smem>>
    %56 = vector.broadcast %55 : f32 to vector<8x128xf32>
    %57 = arith.addf %54, %56 : vector<8x128xf32>
    %58 = math.tanh %57 : vector<8x128xf32>
    %c15 = arith.constant 15 : index
    %59 = memref.load %arg1[%c15] : memref<32xf32, #tpu.memory_space<smem>>
    %60 = vector.broadcast %59 : f32 to vector<8x128xf32>
    %61 = arith.mulf %60, %58 : vector<8x128xf32>
    %62 = arith.addf %47, %61 : vector<8x128xf32>
    %c16 = arith.constant 16 : index
    %63 = memref.load %arg1[%c16] : memref<32xf32, #tpu.memory_space<smem>>
    %64 = vector.broadcast %63 : f32 to vector<8x128xf32>
    %65 = arith.addf %62, %64 : vector<8x128xf32>
    %66 = math.tanh %65 : vector<8x128xf32>
    %cst = arith.constant 5.000000e-01 : f32
    %67 = vector.broadcast %cst : f32 to vector<8x128xf32>
    %68 = arith.mulf %67, %66 : vector<8x128xf32>
    %cst_6 = arith.constant 5.000000e-01 : f32
    %69 = vector.broadcast %cst_6 : f32 to vector<8x128xf32>
    %70 = arith.addf %68, %69 : vector<8x128xf32>
    %c0_7 = arith.constant 0 : index
    %c0_8 = arith.constant 0 : index
    %71 = vector.load %arg3[%c0_7, %c0_8] : memref<8x128xf32, #tpu.memory_space<vmem>>, vector<8x128xf32>
    tpu.vector_store %arg3[%c0_7, %c0_8], %70 {strides = array<i32>} : memref<8x128xf32, #tpu.memory_space<vmem>>, vector<8x128xf32>,
    return
  }
  func.func @transform_0(%arg0: i32) -> i32 {
    %c0_i32 = arith.constant 0 : i32
    %c0_i32_0 = arith.constant 0 : i32
    return %c0_i32 : i32
  }
  func.func @transform_1(%arg0: i32) -> (i32, i32, i32) {
    %c0_i32 = arith.constant 0 : i32
    %c0_i32_0 = arith.constant 0 : i32
    %c0_i32_1 = arith.constant 0 : i32
    return %c0_i32, %arg0, %c0_i32_0 : i32, i32, i32
  }
  func.func @transform_2(%arg0: i32) -> (i32, i32) {
    %c0_i32 = arith.constant 0 : i32
    %c0_i32_0 = arith.constant 0 : i32
    return %arg0, %c0_i32 : i32, i32
  }
}

</mosaic_0001>

<bundles_post_ra>
// kernel: tpu_custom_call.1
= control target key start
LH: loop header
LB: loop body
LE: loop exit
PB: predicated region body
PF: predicated region fallthrough
CT: control target
= control target key end

     0   :  { %7 = vsyncpa [#allocation5], 0  ;;  %s236_s0 = inlined_call_operand.hbm [shape: f32[32], index: 0, kind: input, shape index: {}]   ;;  %s237_s1 = inlined_call_operand.hbm [shape: f32[2,8,128], index: 1, kind: input, shape index: {}]   ;;  %s238_s2 = inlined_call_operand.hbm [shape: f32[8,128], index: 2, kind: output, shape index: {}]  }
   0x1   :  { %8 = vsyncpa [#allocation3], 0 }
   0x2   :  { %9 = vsyncpa [#allocation4], 0  ;;  %s207_s9 = smov [#allocation2]   ;;  %s208_s12 = smov [#allocation6]  }
   0x3   :  { %17 = dma.hbm_to_smem %s236_s0, 16, %s207_s9, [#allocation5]  }
   0x4   :  { %s23_s13 = sshll.u32 %s208_s12, 4  ;;  %s24_s13 = int_to_ptr.vmem [resolvable:$true] %s23_s13 }
   0x5   :  { %s169_s14 = scalar_lea.vmem %s24_s13, 256  ;;  %p174_p1 = scmp.lt.s32.totalorder %s24_s13, %s24_s13 }
   0x6   :  { %p170_p0 = scmp.ne.s32.totalorder %s24_s13, %s169_s14  ;;  %p175_p2 = scmp.lt.s32.totalorder %s169_s14, %s169_s14 }
   0x8   :  { %p176_p3 = por %p175_p2, %p174_p1 }
   0xa   :  { %p177_p4 = pnand %p176_p3, %p170_p0 }
   0xc   :  { %180 = shalt.err (!%p177_p4)
}
   0xd   :  { %s209_s15 = smov 128   ;;  %s210_s16 = smov 8  }
   0xe   :  { %29 = dma.hbm_to_vmem [thread:$0]  %s237_s1, 256, %s24_s13, [#allocation3], %s209_s15, %s209_s15, %s210_s16  }
   0xf   :  { %201 = dma.done.wait [#allocation5], 16  }
  0x10   :  { %202 = vsyncadd [#allocation5], 4294967280 }
  0x11   :  { %203 = dma.done.wait [#allocation3], 256  }
  0x12   :  { %204 = vsyncadd [#allocation3], 4294967040 }
  0x13   :  { %36 = sfence }
  0x14   :  { %s40_s0 = sld [smem:[#allocation2]]  ;;  %v37_v0 = vld [vmem:[#allocation6] sm:$0xff]  ;;  %v39_v1 = vld [vmem:[#allocation6 + $0x8] sm:$0xff]  ;;  %s211_s6 = smov [#allocation7]  }
  0x15   :  { %s122_s19 = sld [smem:[#allocation2 + $0x1]]  ;;  %s112_s7 = sshll.u32 %s211_s6, 4  ;;  %s113_s7 = int_to_ptr.vmem [resolvable:$true] %s112_s7 }
  0x16   :  { %s123_s20 = sld [smem:[#allocation2 + $0x8]]  ;;  %s181_s8 = scalar_lea.vmem %s113_s7, 128 }
  0x17   :  { %s125_s21 = sld [smem:[#allocation2 + $0x2]]  ;;  %p182_p5 = scmp.ne.s32.totalorder %s113_s7, %s181_s8 }
  0x18   :  { %s126_s22 = sld [smem:[#allocation2 + $0x3]]  ;;  %p186_p6 = scmp.lt.s32.totalorder %s113_s7, %s113_s7 }
  0x19   :  { %s127_s23 = sld [smem:[#allocation2 + $0x9]]  ;;  %p187_p7 = scmp.lt.s32.totalorder %s181_s8, %s181_s8 }
  0x1a   :  { %v41_v2 = vstv %s40_s0  ;;  %s129_s24 = sld [smem:[#allocation2 + $0x4]] }
  0x1b   :  { %v42_v3 = vmul.f32 %v41_v2, %v37_v0  ;;  %v44_v4 = vstv %s122_s19  ;;  %s130_s1 = sld [smem:[#allocation2 + $0x5]]  ;;  %p188_p8 = por %p187_p7, %p186_p6 }
  0x1c   :  { %v45_v5 = vmul.f32 %v44_v4, %v39_v1  ;;  %v48_v6 = vstv %s123_s20  ;;  %s131_s25 = sld [smem:[#allocation2 + $0xa]] }
  0x1d   :  { %v55_v8 = vstv %s125_s21  ;;  %s133_s26 = sld [smem:[#allocation2 + $0x6]]  ;;  %p189_p9 = pnand %p188_p8, %p182_p5 }
  0x1e   :  { %v46_v7 = vadd.f32 %v45_v5, %v42_v3  ;;  %v56_v9 = vmul.f32 %v55_v8, %v37_v0  ;;  %v58_v10 = vstv %s126_s22  ;;  %s134_s27 = sld [smem:[#allocation2 + $0x7]] }
  0x1f   :  { %v59_v12 = vmul.f32 %v58_v10, %v39_v1  ;;  %v62_v13 = vstv %s127_s23  ;;  %s135_s28 = sld [smem:[#allocation2 + $0xb]] }
  0x20   :  { %v49_v11 = vadd.f32 %v48_v6, %v46_v7  ;;  %v70_v15 = vstv %s129_s24  ;;  %s124_s29 = sld [smem:[#allocation2 + $0xc]] }
  0x21   :  { %v60_v14 = vadd.f32 %v59_v12, %v56_v9  ;;  %v71_v16 = vmul.f32 %v70_v15, %v37_v0  ;;  %v73_v17 = vstv %s130_s1  ;;  %s128_s30 = sld [smem:[#allocation2 + $0xd]] }
  0x22   :  { %143 = vtanh.f32 %v49_v11  ;;  %v74_v19 = vmul.f32 %v73_v17, %v39_v1  ;;  %v77_v20 = vstv %s131_s25  ;;  %s132_s3 = sld [smem:[#allocation2 + $0xe]] }
  0x23   :  { %v63_v18 = vadd.f32 %v62_v13, %v60_v14  ;;  %v85_v22 = vstv %s133_s26  ;;  %s136_s4 = sld [smem:[#allocation2 + $0xf]] }
  0x24   :  { %v75_v21 = vadd.f32 %v74_v19, %v71_v16  ;;  %v86_v23 = vmul.f32 %v85_v22, %v37_v0  ;;  %v88_v24 = vstv %s134_s27  ;;  %s137_s5 = sld [smem:[#allocation2 + $0x10]] }
  0x25   :  { %145 = vtanh.f32 %v63_v18  ;;  %v89_v26 = vmul.f32 %v88_v24, %v39_v1  ;;  %v92_v27 = vstv %s135_s28 }
  0x26   :  { %v78_v25 = vadd.f32 %v77_v20, %v75_v21  ;;  %v52_v31 = vstv %s124_s29 }
  0x27   :  { %v90_v28 = vadd.f32 %v89_v26, %v86_v23  ;;  %v66_v32 = vstv %s128_s30 }
  0x28   :  { %147 = vtanh.f32 %v78_v25  ;;  %v81_v36 = vstv %s132_s3 }
  0x29   :  { %v93_v29 = vadd.f32 %v92_v27, %v90_v28  ;;  %v96_v40 = vstv %s136_s4 }
  0x2a   :  { %v100_v44 = vstv %s137_s5 }
  0x2b   :  { %149 = vtanh.f32 %v93_v29 }
  0x2f   :  { %v144_v30 = vpop.eup %143 }
  0x30   :  { %v53_v33 = vmul.f32 %v144_v30, %v52_v31 }
  0x32   :  { %v146_v34 = vpop.eup %145 }
  0x33   :  { %v67_v35 = vmul.f32 %v146_v34, %v66_v32 }
  0x35   :  { %v68_v37 = vadd.f32 %v67_v35, %v53_v33  ;;  %v148_v38 = vpop.eup %147 }
  0x36   :  { %v82_v39 = vmul.f32 %v148_v38, %v81_v36 }
  0x38   :  { %v83_v41 = vadd.f32 %v82_v39, %v68_v37  ;;  %v150_v42 = vpop.eup %149 }
  0x39   :  { %v97_v43 = vmul.f32 %v150_v42, %v96_v40 }
  0x3b   :  { %v98_v45 = vadd.f32 %v97_v43, %v83_v41 }
  0x3d   :  { %v101_v46 = vadd.f32 %v100_v44, %v98_v45 }
  0x3f   :  { %151 = vtanh.f32 %v101_v46 }
  0x4c   :  { %v152_v47 = vpop.eup %151 }
  0x4d   :  { %v103_v48 = vmul.f32 0.5, %v152_v47 }
  0x4f   :  { %v104_v49 = vadd.f32 0.5, %v103_v48 }
  0x51   :  { %105 = vst [vmem:[#allocation7] sm:$0xff] %v104_v49 }
  0x52   :  { %192 = shalt.err (!%p189_p9)
}
  0x53   :  { %115 = dma.vmem_to_hbm [thread:$0]  %s113_s7, 128, %s238_s2, [#allocation4]  }
  0x54   :  { %205 = dma.done.wait [#allocation4], 128  }
  0x55   :  { %206 = vsyncadd [#allocation4], 4294967168 }
  0x56   :  { %119 = vsyncpa [#allocation3], 1 }
  0x57   :  { %120 = vsyncpa [#allocation4], 1 }
  0x58   :  { %121 = vsyncpa [#allocation5], 1 }

</bundles_post_ra>
